<compile_context>
chip_gen: v7x
topology: tpu7x:2x2x1
jax: 0.10.0
libtpu: 0.0.40
codegen_flags: <defaults>
</compile_context>

<pallas_src>
import functools

import jax
import jax.numpy as jnp
import numpy as np
from jax.experimental import pallas as pl
from jax.experimental.pallas import tpu as pltpu


# ----------------------------------------------------------------------------
# Fused forward kernel: LSTM recurrence + fc1 stack + fc2 classifier (pos&neg)
# ----------------------------------------------------------------------------
def make_fused_kernel(S, B, H, n_fc1, n_fc2, layout):
    SB = S * B

    def kernel(x_ref, hc0_ref, det_ref, blob_ref, cls_out_ref, hc_out_ref):
        f32 = jnp.float32

        def p(name):
            off, r, c = layout[name]            # static ints; 8-aligned offsets
            return blob_ref[off:off + r, :c]

        wih = p("wih")                          # (I, 4H), gate cols [i, f, o, g]
        whh = p("whh")                          # (H, 4H)  -- read once, hoisted
        b_lstm = p("b_lstm")                    # (1, 4H)

        # Input projection for all timesteps in one MXU push, bias folded in.
        xw = jnp.dot(x_ref[...], wih, preferred_element_type=f32) + b_lstm

        h = hc0_ref[0]                          # (B, H)
        c = hc0_ref[1]                          # (B, H)
        hs = []
        # Recurrence fully unrolled (S small & static); all per-step state
        # stays in vregs -- no VMEM scratch traffic on the serial chain.
        # TODO(synk): drive the MXU explicitly (matmul_push_rhs/acc/pop) if the
        # bundle dump shows W_hh being re-staged every step.
        for t in range(S):
            g = xw[t * B:(t + 1) * B, :] + jnp.dot(
                h, whh, preferred_element_type=f32)
            sig = jax.nn.sigmoid(g[:, :3 * H])   # [i | f | o] in one sigmoid
            i_g = sig[:, 0 * H:1 * H]
            f_g = sig[:, 1 * H:2 * H]
            o_g = sig[:, 2 * H:3 * H]
            g_g = jnp.tanh(g[:, 3 * H:4 * H])    # g gate
            c = f_g * c + i_g * g_g
            h = o_g * jnp.tanh(c)
            hs.append(h)
        hc_out_ref[...] = jnp.stack([h, c], axis=0).astype(hc_out_ref.dtype)

        # fc1 stack on the whole sequence at once (ReLU on all but last layer).
        y = jnp.concatenate(hs, axis=0)          # (S*B, H)
        for li in range(n_fc1):
            y = (jnp.dot(y, p(f"fc1_w_{li}"), preferred_element_type=f32)
                 + p(f"fc1_b_{li}"))
            if li < n_fc1 - 1:
                y = jnp.maximum(y, 0.0)
        # y: (S*B, 102)

        # fc2 classifier.  torch.cat([y, det]) fused into layer 0 as a split-K
        # matmul; the out102 half (y @ W2_top) is computed ONCE and reused for
        # both detection branches.
        det = det_ref[...]                       # (2*S*B, 102) = [pos ; neg]
        w2b = p("w2b")
        b2 = p("b2")
        ztop = jnp.dot(y, p("w2t"), preferred_element_type=f32)
        z_pos = ztop + jnp.dot(det[:SB], w2b, preferred_element_type=f32) + b2
        z_neg = ztop + jnp.dot(det[SB:], w2b, preferred_element_type=f32) + b2
        z = jnp.concatenate([z_pos, z_neg], axis=0)   # (2*S*B, N1)
        if n_fc2 > 1:
            z = jnp.maximum(z, 0.0)
        for li in range(1, n_fc2):
            z = (jnp.dot(z, p(f"fc2_w_{li}"), preferred_element_type=f32)
                 + p(f"fc2_b_{li}"))
            if li < n_fc2 - 1:
                z = jnp.maximum(z, 0.0)
        cls_out_ref[...] = z.astype(cls_out_ref.dtype)

    return kernel


def static_lstm_fused(meta, blob, x, h0, c0, pos_det, neg_det):
    """x: (S,B,I); h0,c0: (B,H); detections: (S,B,102); blob: packed params."""
    S, B, I = x.shape
    H = h0.shape[-1]
    SB = S * B

    kernel = make_fused_kernel(S, B, H, meta["n_fc1"], meta["n_fc2"],
                               meta["layout"])
    vmem = pl.BlockSpec(memory_space=pltpu.MemorySpace.VMEM)

    inputs = (
        x.reshape(SB, I),
        jnp.stack([h0, c0], axis=0),                                  # (2,B,H)
        jnp.concatenate([pos_det.reshape(SB, -1),
                         neg_det.reshape(SB, -1)], axis=0),           # (2SB,102)
        blob,                                                         # params
    )
    cls_out, hc_out = pl.pallas_call(
        kernel,
        out_shape=(jax.ShapeDtypeStruct((2 * SB, 2), jnp.float32),    # pos;neg
                   jax.ShapeDtypeStruct((2, B, H), jnp.float32)),     # hn;cn
        in_specs=[vmem] * len(inputs),
        out_specs=(vmem, vmem),
    )(*inputs)

    pos = cls_out[:SB].reshape(S, B, 2)
    neg = cls_out[SB:].reshape(S, B, 2)
    return pos, neg, hc_out[0], hc_out[1]


# ----------------------------------------------------------------------------
# Parameter construction (mirrors StaticLSTM.__init__ shapes)
# ----------------------------------------------------------------------------
def init_params(key, input_size, hidden_size, n_lstm_fc, n_cls_fc):
    def uniform(k, shape, fan):
        bound = 1.0 / np.sqrt(fan)
        return jax.random.uniform(k, shape, jnp.float32, -bound, bound)

    keys = iter(jax.random.split(key, 64))
    H = hidden_size

    params = {}
    # nn.LSTM: weight_ih (4H, I), weight_hh (4H, H), biases (4H,), gate order
    # [i, f, g, o].  Reordered to [i, f, o, g] so the kernel applies a single
    # sigmoid over the first 3H columns and one tanh over the last H.
    # (The pure-JAX reference uses the same reordered layout, so the math is
    #  identical to PyTorch semantics.  Any imported PyTorch checkpoint must
    #  get the same permutation.)
    w_ih = uniform(next(keys), (4 * H, input_size), H)
    w_hh = uniform(next(keys), (4 * H, H), H)
    b_ih = uniform(next(keys), (4 * H,), H)
    b_hh = uniform(next(keys), (4 * H,), H)
    perm = np.concatenate([np.arange(0, H),            # i
                           np.arange(H, 2 * H),        # f
                           np.arange(3 * H, 4 * H),    # o
                           np.arange(2 * H, 3 * H)])   # g
    params["w_ih_t"] = jnp.asarray(w_ih)[perm].T               # (I, 4H)
    params["w_hh_t"] = jnp.asarray(w_hh)[perm].T               # (H, 4H)
    params["b_lstm"] = (b_ih + b_hh)[perm].reshape(1, 4 * H)   # (1, 4H)

    # fc1: (n_lstm_fc - 1) x [Linear(H,H)+ReLU], then Linear(H,102)
    fc1 = []
    if n_lstm_fc > 0:
        for _ in range(n_lstm_fc - 1):
            w = uniform(next(keys), (H, H), H)
            b = uniform(next(keys), (1, H), H)
            fc1.append((w, b))
        w = uniform(next(keys), (H, 102), H)
        b = uniform(next(keys), (1, 102), H)
        fc1.append((w, b))
    params["fc1"] = fc1

    # fc2: sizes = linspace(204, 2, num=n_cls_fc + 1)
    fc2 = []
    if n_cls_fc > 1:
        sizes = np.linspace(2 * 102, 2, num=n_cls_fc + 1)
        for c in range(n_cls_fc - 1):
            fin, fout = int(sizes[c]), int(sizes[c + 1])
            w = uniform(next(keys), (fin, fout), fin)
            b = uniform(next(keys), (1, fout), fin)
            fc2.append((w, b))
        fin = int(sizes[n_cls_fc - 1])
        w = uniform(next(keys), (fin, 2), fin)
        b = uniform(next(keys), (1, 2), fin)
        fc2.append((w, b))
    # TODO(synk): n_cls_fc == 1 branch (ReLU then Linear(204,2)) and the
    # n_lstm_fc == 0 / single-detection forward branches are not exercised here.
    params["fc2"] = fc2
    return params


# ----------------------------------------------------------------------------
# Pack all parameter tensors into one lane-dense (rows, 128k) f32 blob.
# Done once, host-side, at init time -> one parameter DMA per kernel call.
# ----------------------------------------------------------------------------
def pack_params(params):
    pieces = [("wih", params["w_ih_t"]),
              ("whh", params["w_hh_t"]),
              ("b_lstm", params["b_lstm"])]
    for li, (w, b) in enumerate(params["fc1"]):
        pieces.append((f"fc1_w_{li}", w))
        pieces.append((f"fc1_b_{li}", b))
    w2_full, b2 = params["fc2"][0]
    pieces.append(("w2t", w2_full[:102]))    # out102 half of fc2[0].weight
    pieces.append(("w2b", w2_full[102:]))    # detection half of fc2[0].weight
    pieces.append(("b2", b2))
    for li, (w, b) in enumerate(params["fc2"][1:], start=1):
        pieces.append((f"fc2_w_{li}", w))
        pieces.append((f"fc2_b_{li}", b))

    lane = max(int(a.shape[1]) for _, a in pieces)
    lane = ((lane + 127) // 128) * 128
    bufs, layout, row = [], {}, 0
    for name, a in pieces:
        a_np = np.asarray(a, np.float32)
        r, c = a_np.shape
        rp = ((r + 7) // 8) * 8                       # 8-aligned row offsets
        buf = np.zeros((rp, lane), np.float32)
        buf[:r, :c] = a_np
        bufs.append(buf)
        layout[name] = (row, r, c)
        row += rp
    blob = jnp.asarray(np.concatenate(bufs, axis=0))
    return blob, layout


# ----------------------------------------------------------------------------
# StaticLSTM.forward (both detections supplied)
# ----------------------------------------------------------------------------
def static_lstm_forward(meta, blob, input_data, hidden,
                        positive_detection, negative_detection):
    h0, c0 = hidden
    pos_out, neg_out, hn, cn = static_lstm_fused(
        meta, blob, input_data, h0[0], c0[0],
        positive_detection, negative_detection)
    return pos_out, (hn[None], cn[None]), neg_out


# ----------------------------------------------------------------------------
# Pure-JAX reference (for correctness check; same [i,f,o,g] param layout)
# ----------------------------------------------------------------------------
def reference_forward(params, x, hidden, pos_det, neg_det):
    h0, c0 = hidden[0][0], hidden[1][0]
    H = h0.shape[-1]

    def step(carry, xt):
        h, c = carry
        g = xt @ params["w_ih_t"] + h @ params["w_hh_t"] + params["b_lstm"]
        i = jax.nn.sigmoid(g[:, 0 * H:1 * H])
        f = jax.nn.sigmoid(g[:, 1 * H:2 * H])
        o = jax.nn.sigmoid(g[:, 2 * H:3 * H])
        gg = jnp.tanh(g[:, 3 * H:4 * H])
        c = f * c + i * gg
        h = o * jnp.tanh(c)
        return (h, c), h

    (hn, cn), out = jax.lax.scan(step, (h0, c0), x)

    y = out
    n1 = len(params["fc1"])
    for idx, (w, b) in enumerate(params["fc1"]):
        y = y @ w + b
        if idx < n1 - 1:
            y = jnp.maximum(y, 0.0)

    def cls(det):
        z = jnp.concatenate([y, det], axis=2)
        n2 = len(params["fc2"])
        for idx, (w, b) in enumerate(params["fc2"]):
            z = z @ w + b
            if idx < n2 - 1:
                z = jnp.maximum(z, 0.0)
        return z

    return cls(pos_det), (hn[None], cn[None]), cls(neg_det)


# ----------------------------------------------------------------------------
if __name__ == "__main__":
    INPUT_SIZE, HIDDEN_SIZE = 16, 32
    N_LSTM_FC, N_CLS_FC = 2, 2
    SEQ, BATCH = 8, 2

    root = jax.random.PRNGKey(0)
    k_p, k_x, k_pd, k_nd = jax.random.split(root, 4)

    params = init_params(k_p, INPUT_SIZE, HIDDEN_SIZE, N_LSTM_FC, N_CLS_FC)
    blob, layout = pack_params(params)
    meta = {"layout": layout,
            "n_fc1": len(params["fc1"]),
            "n_fc2": len(params["fc2"])}

    x = jax.random.normal(k_x, (SEQ, BATCH, INPUT_SIZE), jnp.float32)
    h0 = jnp.zeros((1, BATCH, HIDDEN_SIZE), jnp.float32)   # init_hidden()
    c0 = jnp.zeros((1, BATCH, HIDDEN_SIZE), jnp.float32)
    pos_det = jax.random.normal(k_pd, (SEQ, BATCH, 102), jnp.float32)
    neg_det = jax.random.normal(k_nd, (SEQ, BATCH, 102), jnp.float32)

    fwd = jax.jit(functools.partial(static_lstm_forward, meta))
    pos_out, (hn, cn), neg_out = fwd(blob, x, (h0, c0), pos_det, neg_det)
    jax.block_until_ready((pos_out, hn, cn, neg_out))

    # Verify against plain-JAX reference.
    r_pos, (r_hn, r_cn), r_neg = reference_forward(
        params, x, (h0, c0), pos_det, neg_det)
    np.testing.assert_allclose(np.asarray(pos_out), np.asarray(r_pos),
                               rtol=1e-5, atol=1e-5)
    np.testing.assert_allclose(np.asarray(neg_out), np.asarray(r_neg),
                               rtol=1e-5, atol=1e-5)
    np.testing.assert_allclose(np.asarray(hn), np.asarray(r_hn),
                               rtol=1e-5, atol=1e-5)
    np.testing.assert_allclose(np.asarray(cn), np.asarray(r_cn),
                               rtol=1e-5, atol=1e-5)

    assert pos_out.shape == (SEQ, BATCH, 2)
    assert neg_out.shape == (SEQ, BATCH, 2)
    assert hn.shape == (1, BATCH, HIDDEN_SIZE)
    assert cn.shape == (1, BATCH, HIDDEN_SIZE)
    print("KERNEL_OK")
</pallas_src>

<mosaic_0001>
module attributes {stable_mosaic.version = 11 : i64} {
  func.func @kernel(%arg0: memref<16x16xf32, #tpu.memory_space<vmem>>, %arg1: memref<2x2x32xf32, #tpu.memory_space<vmem>>, %arg2: memref<32x102xf32, #tpu.memory_space<vmem>>, %arg3: memref<464x128xf32, #tpu.memory_space<vmem>>, %arg4: memref<32x2xf32, #tpu.memory_space<vmem>>, %arg5: memref<2x2x32xf32, #tpu.memory_space<vmem>>) attributes {dimension_semantics = [], scalar_prefetch = 0 : i64, scratch_operands = 0 : i64, tpu.core_type = #tpu.core_type<tc>} {
    %c0 = arith.constant 0 : index
    %c0_0 = arith.constant 0 : index
    %0 = vector.load %arg3[%c0, %c0_0] : memref<464x128xf32, #tpu.memory_space<vmem>>, vector<16x128xf32>
    %c16 = arith.constant 16 : index
    %c0_1 = arith.constant 0 : index
    %1 = vector.load %arg3[%c16, %c0_1] : memref<464x128xf32, #tpu.memory_space<vmem>>, vector<32x128xf32>
    %c48 = arith.constant 48 : index
    %c0_2 = arith.constant 0 : index
    %2 = vector.load %arg3[%c48, %c0_2] : memref<464x128xf32, #tpu.memory_space<vmem>>, vector<1x128xf32>
    %c0_3 = arith.constant 0 : index
    %c0_4 = arith.constant 0 : index
    %3 = vector.load %arg0[%c0_3, %c0_4] : memref<16x16xf32, #tpu.memory_space<vmem>>, vector<16x16xf32>
    %cst = arith.constant dense<0.000000e+00> : vector<16x128xf32>
    %4 = tpu.matmul %3, %0, %cst {dimension_numbers = #tpu.dot_dimension_numbers<[1], [0], [0], [1], [0, 0, 1, 1], [], []>} : vector<16x16xf32>, vector<16x128xf32>, vector<16x128xf32> -> vector<16x128xf32>
    %5 = vector.broadcast %2 : vector<1x128xf32> to vector<16x128xf32>
    %6 = arith.addf %4, %5 : vector<16x128xf32>
    %c0_5 = arith.constant 0 : index
    %c0_6 = arith.constant 0 : index
    %c0_7 = arith.constant 0 : index
    %7 = vector.load %arg1[%c0_5, %c0_6, %c0_7] : memref<2x2x32xf32, #tpu.memory_space<vmem>>, vector<1x2x32xf32>
    %8 = vector.shape_cast %7 : vector<1x2x32xf32> to vector<2x32xf32>
    %c1 = arith.constant 1 : index
    %c0_8 = arith.constant 0 : index
    %c0_9 = arith.constant 0 : index
    %9 = vector.load %arg1[%c1, %c0_8, %c0_9] : memref<2x2x32xf32, #tpu.memory_space<vmem>>, vector<1x2x32xf32>
    %10 = vector.shape_cast %9 : vector<1x2x32xf32> to vector<2x32xf32>
    %11 = vector.extract_strided_slice %6 {offsets = [0, 0], sizes = [2, 128], strides = [1, 1]} : vector<16x128xf32> to vector<2x128xf32>
    %cst_10 = arith.constant dense<0.000000e+00> : vector<2x128xf32>
    %12 = tpu.matmul %8, %1, %cst_10 {dimension_numbers = #tpu.dot_dimension_numbers<[1], [0], [0], [1], [0, 0, 1, 1], [], []>} : vector<2x32xf32>, vector<32x128xf32>, vector<2x128xf32> -> vector<2x128xf32>
    %13 = arith.addf %11, %12 : vector<2x128xf32>
    %14 = vector.extract_strided_slice %13 {offsets = [0, 0], sizes = [2, 96], strides = [1, 1]} : vector<2x128xf32> to vector<2x96xf32>
    %15 = arith.negf %14 : vector<2x96xf32>
    %16 = math.exp %15 : vector<2x96xf32>
    %cst_11 = arith.constant 1.000000e+00 : f32
    %17 = vector.broadcast %cst_11 : f32 to vector<2x96xf32>
    %18 = arith.addf %17, %16 : vector<2x96xf32>
    %19 = arith.divf %17, %18 : vector<2x96xf32>
    %20 = vector.extract_strided_slice %19 {offsets = [0, 0], sizes = [2, 32], strides = [1, 1]} : vector<2x96xf32> to vector<2x32xf32>
    %21 = vector.extract_strided_slice %19 {offsets = [0, 32], sizes = [2, 32], strides = [1, 1]} : vector<2x96xf32> to vector<2x32xf32>
    %22 = vector.extract_strided_slice %19 {offsets = [0, 64], sizes = [2, 32], strides = [1, 1]} : vector<2x96xf32> to vector<2x32xf32>
    %23 = vector.extract_strided_slice %13 {offsets = [0, 96], sizes = [2, 32], strides = [1, 1]} : vector<2x128xf32> to vector<2x32xf32>
    %24 = math.tanh %23 : vector<2x32xf32>
    %25 = arith.mulf %21, %10 : vector<2x32xf32>
    %26 = arith.mulf %20, %24 : vector<2x32xf32>
    %27 = arith.addf %25, %26 : vector<2x32xf32>
    %28 = math.tanh %27 : vector<2x32xf32>
    %29 = arith.mulf %22, %28 : vector<2x32xf32>
    %30 = vector.extract_strided_slice %6 {offsets = [2, 0], sizes = [2, 128], strides = [1, 1]} : vector<16x128xf32> to vector<2x128xf32>
    %cst_12 = arith.constant dense<0.000000e+00> : vector<2x128xf32>
    %31 = tpu.matmul %29, %1, %cst_12 {dimension_numbers = #tpu.dot_dimension_numbers<[1], [0], [0], [1], [0, 0, 1, 1], [], []>} : vector<2x32xf32>, vector<32x128xf32>, vector<2x128xf32> -> vector<2x128xf32>
    %32 = arith.addf %30, %31 : vector<2x128xf32>
    %33 = vector.extract_strided_slice %32 {offsets = [0, 0], sizes = [2, 96], strides = [1, 1]} : vector<2x128xf32> to vector<2x96xf32>
    %34 = arith.negf %33 : vector<2x96xf32>
    %35 = math.exp %34 : vector<2x96xf32>
    %cst_13 = arith.constant 1.000000e+00 : f32
    %36 = vector.broadcast %cst_13 : f32 to vector<2x96xf32>
    %37 = arith.addf %36, %35 : vector<2x96xf32>
    %38 = arith.divf %36, %37 : vector<2x96xf32>
    %39 = vector.extract_strided_slice %38 {offsets = [0, 0], sizes = [2, 32], strides = [1, 1]} : vector<2x96xf32> to vector<2x32xf32>
    %40 = vector.extract_strided_slice %38 {offsets = [0, 32], sizes = [2, 32], strides = [1, 1]} : vector<2x96xf32> to vector<2x32xf32>
    %41 = vector.extract_strided_slice %38 {offsets = [0, 64], sizes = [2, 32], strides = [1, 1]} : vector<2x96xf32> to vector<2x32xf32>
    %42 = vector.extract_strided_slice %32 {offsets = [0, 96], sizes = [2, 32], strides = [1, 1]} : vector<2x128xf32> to vector<2x32xf32>
    %43 = math.tanh %42 : vector<2x32xf32>
    %44 = arith.mulf %40, %27 : vector<2x32xf32>
    %45 = arith.mulf %39, %43 : vector<2x32xf32>
    %46 = arith.addf %44, %45 : vector<2x32xf32>
    %47 = math.tanh %46 : vector<2x32xf32>
    %48 = arith.mulf %41, %47 : vector<2x32xf32>
    %49 = vector.extract_strided_slice %6 {offsets = [4, 0], sizes = [2, 128], strides = [1, 1]} : vector<16x128xf32> to vector<2x128xf32>
    %cst_14 = arith.constant dense<0.000000e+00> : vector<2x128xf32>
    %50 = tpu.matmul %48, %1, %cst_14 {dimension_numbers = #tpu.dot_dimension_numbers<[1], [0], [0], [1], [0, 0, 1, 1], [], []>} : vector<2x32xf32>, vector<32x128xf32>, vector<2x128xf32> -> vector<2x128xf32>
    %51 = arith.addf %49, %50 : vector<2x128xf32>
    %52 = vector.extract_strided_slice %51 {offsets = [0, 0], sizes = [2, 96], strides = [1, 1]} : vector<2x128xf32> to vector<2x96xf32>
    %53 = arith.negf %52 : vector<2x96xf32>
    %54 = math.exp %53 : vector<2x96xf32>
    %cst_15 = arith.constant 1.000000e+00 : f32
    %55 = vector.broadcast %cst_15 : f32 to vector<2x96xf32>
    %56 = arith.addf %55, %54 : vector<2x96xf32>
    %57 = arith.divf %55, %56 : vector<2x96xf32>
    %58 = vector.extract_strided_slice %57 {offsets = [0, 0], sizes = [2, 32], strides = [1, 1]} : vector<2x96xf32> to vector<2x32xf32>
    %59 = vector.extract_strided_slice %57 {offsets = [0, 32], sizes = [2, 32], strides = [1, 1]} : vector<2x96xf32> to vector<2x32xf32>
    %60 = vector.extract_strided_slice %57 {offsets = [0, 64], sizes = [2, 32], strides = [1, 1]} : vector<2x96xf32> to vector<2x32xf32>
    %61 = vector.extract_strided_slice %51 {offsets = [0, 96], sizes = [2, 32], strides = [1, 1]} : vector<2x128xf32> to vector<2x32xf32>
    %62 = math.tanh %61 : vector<2x32xf32>
    %63 = arith.mulf %59, %46 : vector<2x32xf32>
    %64 = arith.mulf %58, %62 : vector<2x32xf32>
    %65 = arith.addf %63, %64 : vector<2x32xf32>
    %66 = math.tanh %65 : vector<2x32xf32>
    %67 = arith.mulf %60, %66 : vector<2x32xf32>
    %68 = vector.extract_strided_slice %6 {offsets = [6, 0], sizes = [2, 128], strides = [1, 1]} : vector<16x128xf32> to vector<2x128xf32>
    %cst_16 = arith.constant dense<0.000000e+00> : vector<2x128xf32>
    %69 = tpu.matmul %67, %1, %cst_16 {dimension_numbers = #tpu.dot_dimension_numbers<[1], [0], [0], [1], [0, 0, 1, 1], [], []>} : vector<2x32xf32>, vector<32x128xf32>, vector<2x128xf32> -> vector<2x128xf32>
    %70 = arith.addf %68, %69 : vector<2x128xf32>
    %71 = vector.extract_strided_slice %70 {offsets = [0, 0], sizes = [2, 96], strides = [1, 1]} : vector<2x128xf32> to vector<2x96xf32>
    %72 = arith.negf %71 : vector<2x96xf32>
    %73 = math.exp %72 : vector<2x96xf32>
    %cst_17 = arith.constant 1.000000e+00 : f32
    %74 = vector.broadcast %cst_17 : f32 to vector<2x96xf32>
    %75 = arith.addf %74, %73 : vector<2x96xf32>
    %76 = arith.divf %74, %75 : vector<2x96xf32>
    %77 = vector.extract_strided_slice %76 {offsets = [0, 0], sizes = [2, 32], strides = [1, 1]} : vector<2x96xf32> to vector<2x32xf32>
    %78 = vector.extract_strided_slice %76 {offsets = [0, 32], sizes = [2, 32], strides = [1, 1]} : vector<2x96xf32> to vector<2x32xf32>
    %79 = vector.extract_strided_slice %76 {offsets = [0, 64], sizes = [2, 32], strides = [1, 1]} : vector<2x96xf32> to vector<2x32xf32>
    %80 = vector.extract_strided_slice %70 {offsets = [0, 96], sizes = [2, 32], strides = [1, 1]} : vector<2x128xf32> to vector<2x32xf32>
    %81 = math.tanh %80 : vector<2x32xf32>
    %82 = arith.mulf %78, %65 : vector<2x32xf32>
    %83 = arith.mulf %77, %81 : vector<2x32xf32>
    %84 = arith.addf %82, %83 : vector<2x32xf32>
    %85 = math.tanh %84 : vector<2x32xf32>
    %86 = arith.mulf %79, %85 : vector<2x32xf32>
    %87 = vector.extract_strided_slice %6 {offsets = [8, 0], sizes = [2, 128], strides = [1, 1]} : vector<16x128xf32> to vector<2x128xf32>
    %cst_18 = arith.constant dense<0.000000e+00> : vector<2x128xf32>
    %88 = tpu.matmul %86, %1, %cst_18 {dimension_numbers = #tpu.dot_dimension_numbers<[1], [0], [0], [1], [0, 0, 1, 1], [], []>} : vector<2x32xf32>, vector<32x128xf32>, vector<2x128xf32> -> vector<2x128xf32>
    %89 = arith.addf %87, %88 : vector<2x128xf32>
    %90 = vector.extract_strided_slice %89 {offsets = [0, 0], sizes = [2, 96], strides = [1, 1]} : vector<2x128xf32> to vector<2x96xf32>
    %91 = arith.negf %90 : vector<2x96xf32>
    %92 = math.exp %91 : vector<2x96xf32>
    %cst_19 = arith.constant 1.000000e+00 : f32
    %93 = vector.broadcast %cst_19 : f32 to vector<2x96xf32>
    %94 = arith.addf %93, %92 : vector<2x96xf32>
    %95 = arith.divf %93, %94 : vector<2x96xf32>
    %96 = vector.extract_strided_slice %95 {offsets = [0, 0], sizes = [2, 32], strides = [1, 1]} : vector<2x96xf32> to vector<2x32xf32>
    %97 = vector.extract_strided_slice %95 {offsets = [0, 32], sizes = [2, 32], strides = [1, 1]} : vector<2x96xf32> to vector<2x32xf32>
    %98 = vector.extract_strided_slice %95 {offsets = [0, 64], sizes = [2, 32], strides = [1, 1]} : vector<2x96xf32> to vector<2x32xf32>
    %99 = vector.extract_strided_slice %89 {offsets = [0, 96], sizes = [2, 32], strides = [1, 1]} : vector<2x128xf32> to vector<2x32xf32>
    %100 = math.tanh %99 : vector<2x32xf32>
    %101 = arith.mulf %97, %84 : vector<2x32xf32>
    %102 = arith.mulf %96, %100 : vector<2x32xf32>
    %103 = arith.addf %101, %102 : vector<2x32xf32>
    %104 = math.tanh %103 : vector<2x32xf32>
    %105 = arith.mulf %98, %104 : vector<2x32xf32>
    %106 = vector.extract_strided_slice %6 {offsets = [10, 0], sizes = [2, 128], strides = [1, 1]} : vector<16x128xf32> to vector<2x128xf32>
    %cst_20 = arith.constant dense<0.000000e+00> : vector<2x128xf32>
    %107 = tpu.matmul %105, %1, %cst_20 {dimension_numbers = #tpu.dot_dimension_numbers<[1], [0], [0], [1], [0, 0, 1, 1], [], []>} : vector<2x32xf32>, vector<32x128xf32>, vector<2x128xf32> -> vector<2x128xf32>
    %108 = arith.addf %106, %107 : vector<2x128xf32>
    %109 = vector.extract_strided_slice %108 {offsets = [0, 0], sizes = [2, 96], strides = [1, 1]} : vector<2x128xf32> to vector<2x96xf32>
    %110 = arith.negf %109 : vector<2x96xf32>
    %111 = math.exp %110 : vector<2x96xf32>
    %cst_21 = arith.constant 1.000000e+00 : f32
    %112 = vector.broadcast %cst_21 : f32 to vector<2x96xf32>
    %113 = arith.addf %112, %111 : vector<2x96xf32>
    %114 = arith.divf %112, %113 : vector<2x96xf32>
    %115 = vector.extract_strided_slice %114 {offsets = [0, 0], sizes = [2, 32], strides = [1, 1]} : vector<2x96xf32> to vector<2x32xf32>
    %116 = vector.extract_strided_slice %114 {offsets = [0, 32], sizes = [2, 32], strides = [1, 1]} : vector<2x96xf32> to vector<2x32xf32>
    %117 = vector.extract_strided_slice %114 {offsets = [0, 64], sizes = [2, 32], strides = [1, 1]} : vector<2x96xf32> to vector<2x32xf32>
    %118 = vector.extract_strided_slice %108 {offsets = [0, 96], sizes = [2, 32], strides = [1, 1]} : vector<2x128xf32> to vector<2x32xf32>
    %119 = math.tanh %118 : vector<2x32xf32>
    %120 = arith.mulf %116, %103 : vector<2x32xf32>
    %121 = arith.mulf %115, %119 : vector<2x32xf32>
    %122 = arith.addf %120, %121 : vector<2x32xf32>
    %123 = math.tanh %122 : vector<2x32xf32>
    %124 = arith.mulf %117, %123 : vector<2x32xf32>
    %125 = vector.extract_strided_slice %6 {offsets = [12, 0], sizes = [2, 128], strides = [1, 1]} : vector<16x128xf32> to vector<2x128xf32>
    %cst_22 = arith.constant dense<0.000000e+00> : vector<2x128xf32>
    %126 = tpu.matmul %124, %1, %cst_22 {dimension_numbers = #tpu.dot_dimension_numbers<[1], [0], [0], [1], [0, 0, 1, 1], [], []>} : vector<2x32xf32>, vector<32x128xf32>, vector<2x128xf32> -> vector<2x128xf32>
    %127 = arith.addf %125, %126 : vector<2x128xf32>
    %128 = vector.extract_strided_slice %127 {offsets = [0, 0], sizes = [2, 96], strides = [1, 1]} : vector<2x128xf32> to vector<2x96xf32>
    %129 = arith.negf %128 : vector<2x96xf32>
    %130 = math.exp %129 : vector<2x96xf32>
    %cst_23 = arith.constant 1.000000e+00 : f32
    %131 = vector.broadcast %cst_23 : f32 to vector<2x96xf32>
    %132 = arith.addf %131, %130 : vector<2x96xf32>
    %133 = arith.divf %131, %132 : vector<2x96xf32>
    %134 = vector.extract_strided_slice %133 {offsets = [0, 0], sizes = [2, 32], strides = [1, 1]} : vector<2x96xf32> to vector<2x32xf32>
    %135 = vector.extract_strided_slice %133 {offsets = [0, 32], sizes = [2, 32], strides = [1, 1]} : vector<2x96xf32> to vector<2x32xf32>
    %136 = vector.extract_strided_slice %133 {offsets = [0, 64], sizes = [2, 32], strides = [1, 1]} : vector<2x96xf32> to vector<2x32xf32>
    %137 = vector.extract_strided_slice %127 {offsets = [0, 96], sizes = [2, 32], strides = [1, 1]} : vector<2x128xf32> to vector<2x32xf32>
    %138 = math.tanh %137 : vector<2x32xf32>
    %139 = arith.mulf %135, %122 : vector<2x32xf32>
    %140 = arith.mulf %134, %138 : vector<2x32xf32>
    %141 = arith.addf %139, %140 : vector<2x32xf32>
    %142 = math.tanh %141 : vector<2x32xf32>
    %143 = arith.mulf %136, %142 : vector<2x32xf32>
    %144 = vector.extract_strided_slice %6 {offsets = [14, 0], sizes = [2, 128], strides = [1, 1]} : vector<16x128xf32> to vector<2x128xf32>
    %cst_24 = arith.constant dense<0.000000e+00> : vector<2x128xf32>
    %145 = tpu.matmul %143, %1, %cst_24 {dimension_numbers = #tpu.dot_dimension_numbers<[1], [0], [0], [1], [0, 0, 1, 1], [], []>} : vector<2x32xf32>, vector<32x128xf32>, vector<2x128xf32> -> vector<2x128xf32>
    %146 = arith.addf %144, %145 : vector<2x128xf32>
    %147 = vector.extract_strided_slice %146 {offsets = [0, 0], sizes = [2, 96], strides = [1, 1]} : vector<2x128xf32> to vector<2x96xf32>
    %148 = arith.negf %147 : vector<2x96xf32>
    %149 = math.exp %148 : vector<2x96xf32>
    %cst_25 = arith.constant 1.000000e+00 : f32
    %150 = vector.broadcast %cst_25 : f32 to vector<2x96xf32>
    %151 = arith.addf %150, %149 : vector<2x96xf32>
    %152 = arith.divf %150, %151 : vector<2x96xf32>
    %153 = vector.extract_strided_slice %152 {offsets = [0, 0], sizes = [2, 32], strides = [1, 1]} : vector<2x96xf32> to vector<2x32xf32>
    %154 = vector.extract_strided_slice %152 {offsets = [0, 32], sizes = [2, 32], strides = [1, 1]} : vector<2x96xf32> to vector<2x32xf32>
    %155 = vector.extract_strided_slice %152 {offsets = [0, 64], sizes = [2, 32], strides = [1, 1]} : vector<2x96xf32> to vector<2x32xf32>
    %156 = vector.extract_strided_slice %146 {offsets = [0, 96], sizes = [2, 32], strides = [1, 1]} : vector<2x128xf32> to vector<2x32xf32>
    %157 = math.tanh %156 : vector<2x32xf32>
    %158 = arith.mulf %154, %141 : vector<2x32xf32>
    %159 = arith.mulf %153, %157 : vector<2x32xf32>
    %160 = arith.addf %158, %159 : vector<2x32xf32>
    %161 = math.tanh %160 : vector<2x32xf32>
    %162 = arith.mulf %155, %161 : vector<2x32xf32>
    %163 = vector.shape_cast %162 : vector<2x32xf32> to vector<1x2x32xf32>
    %164 = vector.shape_cast %160 : vector<2x32xf32> to vector<1x2x32xf32>
    %165 = tpu.concatenate %163, %164 in 0 : vector<1x2x32xf32>, vector<1x2x32xf32> -> vector<2x2x32xf32>
    %c0_26 = arith.constant 0 : index
    %c0_27 = arith.constant 0 : index
    %c0_28 = arith.constant 0 : index
    %166 = vector.load %arg5[%c0_26, %c0_27, %c0_28] : memref<2x2x32xf32, #tpu.memory_space<vmem>>, vector<2x2x32xf32>
    tpu.vector_store %arg5[%c0_26, %c0_27, %c0_28], %165 {strides = array<i32>} : memref<2x2x32xf32, #tpu.memory_space<vmem>>, vector<2x2x32xf32>,
    %167 = tpu.concatenate %29, %48, %67, %86, %105, %124, %143, %162 in 0 : vector<2x32xf32>, vector<2x32xf32>, vector<2x32xf32>, vector<2x32xf32>, vector<2x32xf32>, vector<2x32xf32>, vector<2x32xf32>, vector<2x32xf32> -> vector<16x32xf32>
    %c56 = arith.constant 56 : index
    %c0_29 = arith.constant 0 : index
    %168 = vector.load %arg3[%c56, %c0_29] : memref<464x128xf32, #tpu.memory_space<vmem>>, vector<32x32xf32>
    %cst_30 = arith.constant dense<0.000000e+00> : vector<16x32xf32>
    %169 = tpu.matmul %167, %168, %cst_30 {dimension_numbers = #tpu.dot_dimension_numbers<[1], [0], [0], [1], [0, 0, 1, 1], [], []>} : vector<16x32xf32>, vector<32x32xf32>, vector<16x32xf32> -> vector<16x32xf32>
    %c88 = arith.constant 88 : index
    %c0_31 = arith.constant 0 : index
    %170 = vector.load %arg3[%c88, %c0_31] : memref<464x128xf32, #tpu.memory_space<vmem>>, vector<1x32xf32>
    %171 = vector.broadcast %170 : vector<1x32xf32> to vector<16x32xf32>
    %172 = arith.addf %169, %171 : vector<16x32xf32>
    %cst_32 = arith.constant 0.000000e+00 : f32
    %173 = vector.broadcast %cst_32 : f32 to vector<16x32xf32>
    %174 = arith.maximumf %172, %173 : vector<16x32xf32>
    %c96 = arith.constant 96 : index
    %c0_33 = arith.constant 0 : index
    %175 = vector.load %arg3[%c96, %c0_33] : memref<464x128xf32, #tpu.memory_space<vmem>>, vector<32x102xf32>
    %cst_34 = arith.constant dense<0.000000e+00> : vector<16x102xf32>
    %176 = tpu.matmul %174, %175, %cst_34 {dimension_numbers = #tpu.dot_dimension_numbers<[1], [0], [0], [1], [0, 0, 1, 1], [], []>} : vector<16x32xf32>, vector<32x102xf32>, vector<16x102xf32> -> vector<16x102xf32>
    %c128 = arith.constant 128 : index
    %c0_35 = arith.constant 0 : index
    %177 = vector.load %arg3[%c128, %c0_35] : memref<464x128xf32, #tpu.memory_space<vmem>>, vector<1x102xf32>
    %178 = vector.broadcast %177 : vector<1x102xf32> to vector<16x102xf32>
    %179 = arith.addf %176, %178 : vector<16x102xf32>
    %c0_36 = arith.constant 0 : index
    %c0_37 = arith.constant 0 : index
    %180 = vector.load %arg2[%c0_36, %c0_37] : memref<32x102xf32, #tpu.memory_space<vmem>>, vector<32x102xf32>
    %c240 = arith.constant 240 : index
    %c0_38 = arith.constant 0 : index
    %181 = vector.load %arg3[%c240, %c0_38] : memref<464x128xf32, #tpu.memory_space<vmem>>, vector<102x103xf32>
    %c344 = arith.constant 344 : index
    %c0_39 = arith.constant 0 : index
    %182 = vector.load %arg3[%c344, %c0_39] : memref<464x128xf32, #tpu.memory_space<vmem>>, vector<1x103xf32>
    %c136 = arith.constant 136 : index
    %c0_40 = arith.constant 0 : index
    %183 = vector.load %arg3[%c136, %c0_40] : memref<464x128xf32, #tpu.memory_space<vmem>>, vector<102x103xf32>
    %cst_41 = arith.constant dense<0.000000e+00> : vector<16x103xf32>
    %184 = tpu.matmul %179, %183, %cst_41 {dimension_numbers = #tpu.dot_dimension_numbers<[1], [0], [0], [1], [0, 0, 1, 1], [], []>} : vector<16x102xf32>, vector<102x103xf32>, vector<16x103xf32> -> vector<16x103xf32>
    %185 = vector.extract_strided_slice %180 {offsets = [0, 0], sizes = [16, 102], strides = [1, 1]} : vector<32x102xf32> to vector<16x102xf32>
    %cst_42 = arith.constant dense<0.000000e+00> : vector<16x103xf32>
    %186 = tpu.matmul %185, %181, %cst_42 {dimension_numbers = #tpu.dot_dimension_numbers<[1], [0], [0], [1], [0, 0, 1, 1], [], []>} : vector<16x102xf32>, vector<102x103xf32>, vector<16x103xf32> -> vector<16x103xf32>
    %187 = arith.addf %184, %186 : vector<16x103xf32>
    %188 = vector.broadcast %182 : vector<1x103xf32> to vector<16x103xf32>
    %189 = arith.addf %187, %188 : vector<16x103xf32>
    %190 = vector.extract_strided_slice %180 {offsets = [16, 0], sizes = [16, 102], strides = [1, 1]} : vector<32x102xf32> to vector<16x102xf32>
    %cst_43 = arith.constant dense<0.000000e+00> : vector<16x103xf32>
    %191 = tpu.matmul %190, %181, %cst_43 {dimension_numbers = #tpu.dot_dimension_numbers<[1], [0], [0], [1], [0, 0, 1, 1], [], []>} : vector<16x102xf32>, vector<102x103xf32>, vector<16x103xf32> -> vector<16x103xf32>
    %192 = arith.addf %184, %191 : vector<16x103xf32>
    %193 = vector.broadcast %182 : vector<1x103xf32> to vector<16x103xf32>
    %194 = arith.addf %192, %193 : vector<16x103xf32>
    %195 = tpu.concatenate %189, %194 in 0 : vector<16x103xf32>, vector<16x103xf32> -> vector<32x103xf32>
    %cst_44 = arith.constant 0.000000e+00 : f32
    %196 = vector.broadcast %cst_44 : f32 to vector<32x103xf32>
    %197 = arith.maximumf %195, %196 : vector<32x103xf32>
    %c352 = arith.constant 352 : index
    %c0_45 = arith.constant 0 : index
    %198 = vector.load %arg3[%c352, %c0_45] : memref<464x128xf32, #tpu.memory_space<vmem>>, vector<103x2xf32>
    %cst_46 = arith.constant dense<0.000000e+00> : vector<32x2xf32>
    %199 = tpu.matmul %197, %198, %cst_46 {dimension_numbers = #tpu.dot_dimension_numbers<[1], [0], [0], [1], [0, 0, 1, 1], [], []>} : vector<32x103xf32>, vector<103x2xf32>, vector<32x2xf32> -> vector<32x2xf32>
    %c456 = arith.constant 456 : index
    %c0_47 = arith.constant 0 : index
    %200 = vector.load %arg3[%c456, %c0_47] : memref<464x128xf32, #tpu.memory_space<vmem>>, vector<1x2xf32>
    %201 = vector.broadcast %200 : vector<1x2xf32> to vector<32x2xf32>
    %202 = arith.addf %199, %201 : vector<32x2xf32>
    %c0_48 = arith.constant 0 : index
    %c0_49 = arith.constant 0 : index
    %203 = vector.load %arg4[%c0_48, %c0_49] : memref<32x2xf32, #tpu.memory_space<vmem>>, vector<32x2xf32>
    tpu.vector_store %arg4[%c0_48, %c0_49], %202 {strides = array<i32>} : memref<32x2xf32, #tpu.memory_space<vmem>>, vector<32x2xf32>,
    return
  }
}

</mosaic_0001>

<bundles_post_ra>
// kernel: static_lstm_forward.1
= control target key start
LH: loop header
LB: loop body
LE: loop exit
PB: predicated region body
PF: predicated region fallthrough
CT: control target
= control target key end

     0   :  { %11 = vsyncpa [#allocation3], 0  ;;  %s2273_s18 = smov [#allocation2]   ;;  %s2533_s0 = inlined_call_operand.vmem [shape: f32[16,16], index: 0, kind: input, shape index: {}]   ;;  %s2534_s1 = inlined_call_operand.vmem [shape: f32[2,2,32], index: 1, kind: input, shape index: {}]   ;;  %s2535_s2 = inlined_call_operand.vmem [shape: f32[32,102], index: 2, kind: input, shape index: {}]   ;;  %s2536_s3 = inlined_call_operand.hbm [shape: f32[464,128], index: 3, kind: input, shape index: {}]   ;;  %s2537_s4 = inlined_call_operand.vmem [shape: f32[32,2], index: 4, kind: output, shape index: {0}]   ;;  %s2538_s5 = inlined_call_operand.vmem [shape: f32[2,2,32], index: 5, kind: output, shape index: {1}]  }
   0x1   :  { %s23_s19 = sshll.u32 %s2273_s18, 4  ;;  %s2249_s22 = scalar_lea.hbm %s2536_s3, 7424  ;;  %s24_s19 = int_to_ptr.vmem [resolvable:$true] %s23_s19 }
   0x2   :  { %p2250_p0 = scmp.ne.s32.totalorder %s2536_s3, %s2249_s22  ;;  %p2253_p1 = scmp.lt.u32.totalorder %s2249_s22, %s2536_s3 }
   0x4   :  { %p2255_p2 = pnand %p2253_p1, %p2250_p0 }
   0x6   :  { %2258 = shalt.err (!%p2255_p2)
}
   0x7   :  { %s2259_s27 = scalar_lea.vmem %s24_s19, 7424  ;;  %p2264_p4 = scmp.lt.s32.totalorder %s24_s19, %s24_s19 }
   0x8   :  { %p2260_p3 = scmp.ne.s32.totalorder %s24_s19, %s2259_s27  ;;  %p2265_p5 = scmp.lt.s32.totalorder %s2259_s27, %s2259_s27 }
   0xa   :  { %p2266_p6 = por %p2265_p5, %p2264_p4 }
   0xc   :  { %p2267_p7 = pnand %p2266_p6, %p2260_p3 }
   0xe   :  { %2270 = shalt.err (!%p2267_p7)
}
   0xf   :  { %s2274_s28 = smov 128   ;;  %s2275_s29 = smov 8  }
  0x10   :  { %29 = dma.hbm_to_vmem [thread:$0]  %s2536_s3, 7424, %s24_s19, [#allocation3], %s2274_s28, %s2274_s28, %s2275_s29  }
  0x11   :  { %2271 = dma.done.wait [#allocation3], 7424  }
  0x12   :  { %2272 = vsyncadd [#allocation3], 4294959872  ;;  %v2276_v0 = vmov 0.0|0.0   ;;  %vm2277_vm0 = vmmov 0   ;;  %v2278_v1 = vmov 0.0   ;;  %vm46_vm1 = vcmask 130048  }
  0x13   :  { %2023 = vmatprep.subr.bf16.mxu0 %v2276_v0  ;;  %1803 = vmatprep.mubr.msk.f32.mxu0 %vm2277_vm0, %v2278_v1  ;;  %v33_v2 = vld [vmem:[#allocation2] sm:$0xff]  ;;  %v34_v3 = vld [vmem:[#allocation2 + $0x8] sm:$0xff]  ;;  %v35_v6 = vld [vmem:[#allocation2 + $0x10] sm:$0xff]  ;;  %vm131_vm2 = vcmask 261120   ;;  %s2279_s11 = smov 32   ;;  %vm991_vm3 = vcmask 1041408  }
  0x14   :  { %v40_v4 = vld [vmem:[%s2533_s0] sm:$0xff]  ;;  %v2013_v5 = vpack.c.bf16 %v34_v3, %v33_v2  ;;  %v36_v7 = vld [vmem:[#allocation2 + $0x18] sm:$0xff]  ;;  %v41_v9 = vld [vmem:[%s2533_s0 + $0x8] sm:$0xff]  ;;  %vm993_vm4 = vcmask 1043456   ;;  %vm995_vm5 = vcmask 1045504   ;;  %vm988_vm6 = vcmask 261126  }
  0x15   :  { %1781 = vmatprep.mubr.msk.f32.mxu1 %vm46_vm1, %v40_v4  ;;  %v2330_v8 = vpack.c.bf16 %v36_v7, %v35_v6  ;;  %v37_v10 = vld [vmem:[#allocation2 + $0x20] sm:$0xff]  ;;  %v38_v11 = vld [vmem:[#allocation2 + $0x28] sm:$0xff]  ;;  %v1617_v14 = vld [vmem:[#allocation2 + $0x30] ss:$0 sm:$0xff]  ;;  %vm1217_vm7 = vcmask 834560   ;;  %vm1514_vm8 = vcmask 1046528  }
  0x16   :  { %2014 = vmatprep.subr.bf16.mxu1 %v2013_v5  ;;  %v2339_v12 = vpack.c.bf16 %v38_v11, %v37_v10  ;;  %v128_v13 = vld [vmem:[%s2534_s1] sm:$0x3]  ;;  %v1620_v23 = vld [vmem:[%s2534_s1 + $0x2] sm:$0x3]  ;;  %s2280_s1 = smov 64   ;;  %vm1501_vm9 = vcmask 842752  }
  0x17   :  { %2016 = vmatpush3.bf16.msra.mxu1 %v2013_v5  ;;  %2025 = vmatpush3.bf16.msra.mxu0 %v2330_v8  ;;  %vm1603_vm10 = vcmask 15360  }
  0x18   :  { %2017 = vmatprep.subr.bf16.mxu1 %v2276_v0  ;;  %2026 = vmatprep.subr.bf16.mxu0 %v2276_v0 }
  0x1a   :  { %1782 = vmatmul.mubr.msk.f32.vlgmr.msra.gmra.mrb[0].mxu1 %vm46_vm1, %v41_v9 }
  0x1b   :  { %2019 = vmatpush3.bf16.msra.mxu1 %v2330_v8  ;;  %1792 = vmatprep.mubr.msk.f32.mxu1 %vm2277_vm0, %v2278_v1 }
  0x1c   :  { %2020 = vmatprep.subr.bf16.mxu1 %v2276_v0  ;;  %2028 = vmatpush3.bf16.msra.mxu0 %v2339_v12 }
  0x1d   :  { %2035 = vmatprep.subr.bf16.mxu0 %v2276_v0 }
  0x1f   :  { %2022 = vmatpush3.bf16.msra.mxu1 %v2339_v12 }
  0x20   :  { %2029 = vmatprep.subr.bf16.mxu1 %v2276_v0 }
  0x22   :  { %1793 = vmatmul.mubr.msk.f32.vlgmr.msra.gmra.mrb[2].mxu1 %vm131_vm2, %v128_v13 }
  0x23   :  { %2031 = vmatpush3.bf16.msra.mxu1 %v2330_v8  ;;  %1814 = vmatprep.mubr.msk.f32.mxu1 %vm2277_vm0, %v2278_v1 }
  0x24   :  { %2032 = vmatprep.subr.bf16.mxu1 %v2276_v0 }
  0x27   :  { %2034 = vmatpush3.bf16.msra.mxu1 %v2339_v12 }
  0x28   :  { %2041 = vmatprep.subr.bf16.mxu1 %v2276_v0 }
  0xed   :  { %v1783_v15 = vpop.f32.mrb[0].mxu1 }
  0xee   :  { %v2359_v16 = vadd.f32 %v1783_v15, %v1617_v14  ;;  %v119_v17 = vpop.f32.mrb[1].mxu1 }
  0xef   :  { %v2361_v18 = vadd.f32 %v1617_v14, %v119_v17 }
  0xf5   :  { %v201_v19 = vpop.f32.mrb[2].mxu1 }
  0xf6   :  { %v205_v20 = vadd.f32 %v201_v19, %v2361_v18  ;;  %v1794_v21 = vpop.f32.mrb[3].mxu1 }
  0xf8   :  { %2185 = vtanh.f32 %v205_v20  ;;  %v1622_v24 = vmul.f32 -1.442695, %v205_v20 }
  0xfa   :  { %2187 = vpow2.f32 %v1622_v24 }
 0x102   :  { %v2186_v22 = vpop.eup %2185 }
 0x103   :  { %219 = vrot.lane.b32.xlu0 %v2186_v22, %s2279_s11 }
 0x104   :  { %v2188_v25 = vpop.eup %2187 }
 0x105   :  { %v209_v26 = vadd.f32 1.0, %v2188_v25 }
 0x107   :  { %214 = vrot.lane.b32.xlu0 %v1620_v23, %s2279_s11  ;;  %2189 = vrcp.f32 %v209_v26 }
 0x111   :  { %v2190_v27 = vpop.eup %2189 }
 0x175   :  { %v220_v28 = vpop.permute.xlu0 %219 }
 0x176   :  { %v222_v29 = vmul.f32 %v2190_v27, %v220_v28 }
 0x178   :  { %224 = vrot.lane.b32.xlu1 %v222_v29, %s2279_s11 }
 0x179   :  { %v215_v30 = vpop.permute.xlu0 %214 }
 0x17a   :  { %v217_v31 = vmul.f32 %v2190_v27, %v215_v30 }
 0x1ea   :  { %v225_v32 = vpop.permute.xlu1 %224 }
 0x1eb   :  { %v227_v33 = vadd.f32 %v225_v32, %v217_v31 }
 0x1ed   :  { %2191 = vtanh.f32 %v227_v33  ;;  %v321_v49 = vrot.slane %v227_v33, 6 }
 0x1f7   :  { %v2192_v34 = vpop.eup %2191 }
 0x1f8   :  { %230 = vrot.lane.b32.xlu1 %v2192_v34, %s2279_s11 }
 0x26a   :  { %v231_v35 = vpop.permute.xlu1 %230 }
 0x26b   :  { %v2371_v36 = vmul.f32 %v2190_v27, %v231_v35 }
 0x26d   :  { %235 = vrot.lane.b32.xlu0 %v2371_v36, %s2280_s1 }
 0x2df   :  { %v236_v37 = vpop.permute.xlu0 %235 }
 0x2e0   :  { %1804 = vmatmul.mubr.msk.f32.vlgmr.msra.gmra.mrb[0].mxu0 %vm131_vm2, %v236_v37 }
 0x2e1   :  { %2037 = vmatpush3.bf16.msra.mxu0 %v2330_v8  ;;  %1825 = vmatprep.mubr.msk.f32.mxu0 %vm2277_vm0, %v2278_v1 }
 0x2e2   :  { %2038 = vmatprep.subr.bf16.mxu0 %v2276_v0 }
 0x2e5   :  { %2040 = vmatpush3.bf16.msra.mxu0 %v2339_v12 }
 0x2e6   :  { %2047 = vmatprep.subr.bf16.mxu0 %v2276_v0 }
 0x3b3   :  { %v305_v38 = vpop.f32.mrb[0].mxu0 }
 0x3b4   :  { %v310_v39 = vrot.slane %v305_v38, 6  ;;  %v1805_v40 = vpop.f32.mrb[1].mxu0 }
 0x3b6   :  { %v312_v41 = vadd.f32 %v310_v39, %v2361_v18 }
 0x3b8   :  { %2193 = vtanh.f32 %v312_v41  ;;  %v1624_v43 = vmul.f32 -1.442695, %v312_v41 }
 0x3ba   :  { %2195 = vpow2.f32 %v1624_v43 }
 0x3c2   :  { %v2194_v42 = vpop.eup %2193 }
 0x3c3   :  { %325 = vrot.lane.b32.xlu1 %v2194_v42, %s2279_s11 }
 0x3c4   :  { %v2196_v44 = vpop.eup %2195 }
 0x3c5   :  { %v316_v45 = vadd.f32 1.0, %v2196_v44 }
 0x3c7   :  { %2197 = vrcp.f32 %v316_v45 }
 0x3d1   :  { %v2198_v46 = vpop.eup %2197 }
 0x3d2   :  { %v323_v50 = vmul.f32 %v2198_v46, %v321_v49 }
 0x435   :  { %v326_v47 = vpop.permute.xlu1 %325 }
 0x436   :  { %v328_v48 = vmul.f32 %v2198_v46, %v326_v47 }
 0x438   :  { %330 = vrot.lane.b32.xlu0 %v328_v48, %s2279_s11 }
 0x4aa   :  { %v331_v51 = vpop.permute.xlu0 %330 }
 0x4ab   :  { %v333_v52 = vadd.f32 %v331_v51, %v323_v50 }
 0x4ad   :  { %2199 = vtanh.f32 %v333_v52  ;;  %v428_v7 = vrot.slane %v333_v52, 6 }
 0x4b7   :  { %v2200_v53 = vpop.eup %2199 }
 0x4b8   :  { %336 = vrot.lane.b32.xlu1 %v2200_v53, %s2279_s11 }
 0x52a   :  { %v337_v54 = vpop.permute.xlu1 %336 }
 0x52b   :  { %v339_v55 = vmul.f32 %v2198_v46, %v337_v54 }
 0x52d   :  { %v341_v56 = vrot.slane %v339_v55, 2  ;;  %v992_v17 = vsel %vm991_vm3, %v2371_v36, %v339_v55 }
 0x52f   :  { %342 = vrot.lane.b32.xlu0 %v341_v56, %s2280_s1 }
 0x5a1   :  { %v343_v57 = vpop.permute.xlu0 %342 }
 0x5a2   :  { %1815 = vmatmul.mubr.msk.f32.vlgmr.msra.gmra.mrb[4].mxu1 %vm131_vm2, %v343_v57 }
 0x5a3   :  { %2043 = vmatpush3.bf16.msra.mxu1 %v2330_v8  ;;  %1836 = vmatprep.mubr.msk.f32.mxu1 %vm2277_vm0, %v2278_v1 }
 0x5a4   :  { %2044 = vmatprep.subr.bf16.mxu1 %v2276_v0 }
 0x5a7   :  { %2046 = vmatpush3.bf16.msra.mxu1 %v2339_v12 }
 0x5a8   :  { %2053 = vmatprep.subr.bf16.mxu1 %v2276_v0 }
 0x675   :  { %v412_v58 = vpop.f32.mrb[4].mxu1 }
 0x676   :  { %v417_v59 = vrot.slane %v412_v58, 4  ;;  %v1816_v60 = vpop.f32.mrb[5].mxu1 }
 0x678   :  { %v419_v61 = vadd.f32 %v417_v59, %v2361_v18 }
 0x67a   :  { %2201 = vtanh.f32 %v419_v61  ;;  %v1626_v63 = vmul.f32 -1.442695, %v419_v61 }
 0x67c   :  { %2203 = vpow2.f32 %v1626_v63 }
 0x684   :  { %v2202_v62 = vpop.eup %2201 }
 0x685   :  { %432 = vrot.lane.b32.xlu1 %v2202_v62, %s2279_s11 }
 0x686   :  { %v2204_v2 = vpop.eup %2203 }
 0x687   :  { %v423_v3 = vadd.f32 1.0, %v2204_v2 }
 0x689   :  { %2205 = vrcp.f32 %v423_v3 }
 0x693   :  { %v2206_v4 = vpop.eup %2205 }
 0x694   :  { %v430_v9 = vmul.f32 %v2206_v4, %v428_v7 }
 0x6f7   :  { %v433_v5 = vpop.permute.xlu1 %432 }
 0x6f8   :  { %v435_v6 = vmul.f32 %v2206_v4, %v433_v5 }
 0x6fa   :  { %437 = vrot.lane.b32.xlu0 %v435_v6, %s2279_s11 }
 0x76c   :  { %v438_v10 = vpop.permute.xlu0 %437 }
 0x76d   :  { %v440_v11 = vadd.f32 %v438_v10, %v430_v9 }
 0x76f   :  { %2207 = vtanh.f32 %v440_v11  ;;  %v535_v33 = vrot.slane %v440_v11, 6 }
 0x779   :  { %v2208_v13 = vpop.eup %2207 }
 0x77a   :  { %443 = vrot.lane.b32.xlu1 %v2208_v13, %s2279_s11 }
 0x7ec   :  { %v444_v14 = vpop.permute.xlu1 %443 }
 0x7ed   :  { %v446_v15 = vmul.f32 %v2206_v4, %v444_v14 }
 0x7ef   :  { %v448_v19 = vrot.slane %v446_v15, 4  ;;  %v994_v20 = vsel %vm993_vm4, %v992_v17, %v446_v15 }
 0x7f1   :  { %449 = vrot.lane.b32.xlu0 %v448_v19, %s2280_s1 }
 0x863   :  { %v450_v21 = vpop.permute.xlu0 %449 }
 0x864   :  { %1826 = vmatmul.mubr.msk.f32.vlgmr.msra.gmra.mrb[2].mxu0 %vm131_vm2, %v450_v21 }
 0x865   :  { %2049 = vmatpush3.bf16.msra.mxu0 %v2330_v8  ;;  %1847 = vmatprep.mubr.msk.f32.mxu0 %vm2277_vm0, %v2278_v1 }
 0x866   :  { %2050 = vmatprep.subr.bf16.mxu0 %v2276_v0 }
 0x869   :  { %2052 = vmatpush3.bf16.msra.mxu0 %v2339_v12 }
 0x86a   :  { %2059 = vmatprep.subr.bf16.mxu0 %v2276_v0 }
 0x937   :  { %v519_v22 = vpop.f32.mrb[2].mxu0 }
 0x938   :  { %v524_v23 = vrot.slane %v519_v22, 2  ;;  %v1827_v24 = vpop.f32.mrb[3].mxu0 }
 0x93a   :  { %v526_v25 = vadd.f32 %v524_v23, %v2361_v18 }
 0x93c   :  { %2209 = vtanh.f32 %v526_v25  ;;  %v1628_v27 = vmul.f32 -1.442695, %v526_v25 }
 0x93e   :  { %2211 = vpow2.f32 %v1628_v27 }
 0x946   :  { %v2210_v26 = vpop.eup %2209 }
 0x947   :  { %539 = vrot.lane.b32.xlu1 %v2210_v26, %s2279_s11 }
 0x948   :  { %v2212_v28 = vpop.eup %2211 }
 0x949   :  { %v530_v29 = vadd.f32 1.0, %v2212_v28 }
 0x94b   :  { %2213 = vrcp.f32 %v530_v29 }
 0x955   :  { %v2214_v30 = vpop.eup %2213 }
 0x956   :  { %v537_v34 = vmul.f32 %v2214_v30, %v535_v33 }
 0x9b9   :  { %v540_v31 = vpop.permute.xlu1 %539 }
 0x9ba   :  { %v542_v32 = vmul.f32 %v2214_v30, %v540_v31 }
 0x9bc   :  { %544 = vrot.lane.b32.xlu0 %v542_v32, %s2279_s11 }
 0xa2e   :  { %v545_v35 = vpop.permute.xlu0 %544 }
 0xa2f   :  { %v547_v36 = vadd.f32 %v545_v35, %v537_v34 }
 0xa31   :  { %2215 = vtanh.f32 %v547_v36  ;;  %v639_v52 = vrot.slane %v547_v36, 6 }
 0xa3b   :  { %v2216_v18 = vpop.eup %2215 }
 0xa3c   :  { %550 = vrot.lane.b32.xlu1 %v2216_v18, %s2279_s11 }
 0xaae   :  { %v551_v37 = vpop.permute.xlu1 %550 }
 0xaaf   :  { %v553_v38 = vmul.f32 %v2214_v30, %v551_v37 }
 0xab1   :  { %v555_v39 = vrot.slane %v553_v38, 6  ;;  %v2414_v40 = vsel %vm995_vm5, %v994_v20, %v553_v38 }
 0xab3   :  { %556 = vrot.lane.b32.xlu0 %v555_v39, %s2280_s1 }
 0xb25   :  { %v557_v41 = vpop.permute.xlu0 %556 }
 0xb26   :  { %1837 = vmatmul.mubr.msk.f32.vlgmr.msra.gmra.mrb[6].mxu1 %vm131_vm2, %v557_v41 }
 0xb27   :  { %2055 = vmatpush3.bf16.msra.mxu1 %v2330_v8  ;;  %1858 = vmatprep.mubr.msk.f32.mxu1 %vm2277_vm0, %v2278_v1 }
 0xb28   :  { %2056 = vmatprep.subr.bf16.mxu1 %v2276_v0 }
 0xb2b   :  { %2058 = vmatpush3.bf16.msra.mxu1 %v2339_v12 }
 0xbf9   :  { %v626_v42 = vpop.f32.mrb[6].mxu1 }
 0xbfa   :  { %v630_v43 = vadd.f32 %v626_v42, %v2359_v16  ;;  %v1838_v44 = vpop.f32.mrb[7].mxu1 }
 0xbfc   :  { %2217 = vtanh.f32 %v630_v43  ;;  %v1630_v46 = vmul.f32 -1.442695, %v630_v43 }
 0xbfe   :  { %2219 = vpow2.f32 %v1630_v46 }
 0xc06   :  { %v2218_v45 = vpop.eup %2217 }
 0xc07   :  { %643 = vrot.lane.b32.xlu1 %v2218_v45, %s2279_s11 }
 0xc08   :  { %v2220_v47 = vpop.eup %2219 }
 0xc09   :  { %v634_v48 = vadd.f32 1.0, %v2220_v47 }
 0xc0b   :  { %2221 = vrcp.f32 %v634_v48 }
 0xc15   :  { %v2222_v49 = vpop.eup %2221 }
 0xc16   :  { %v641_v53 = vmul.f32 %v2222_v49, %v639_v52 }
 0xc79   :  { %v644_v50 = vpop.permute.xlu1 %643 }
 0xc7a   :  { %v646_v51 = vmul.f32 %v2222_v49, %v644_v50 }
 0xc7c   :  { %648 = vrot.lane.b32.xlu0 %v646_v51, %s2279_s11 }
 0xcee   :  { %v649_v54 = vpop.permute.xlu0 %648 }
 0xcef   :  { %v651_v55 = vadd.f32 %v649_v54, %v641_v53 }
 0xcf1   :  { %2223 = vtanh.f32 %v651_v55 }
 0xcfb   :  { %v2224_v56 = vpop.eup %2223 }
 0xcfc   :  { %654 = vrot.lane.b32.xlu1 %v2224_v56, %s2279_s11  ;;  %v1000_v56 = vld [vmem:[#allocation2 + $0x38] sm:$0xff] }
 0xd6e   :  { %v655_v57 = vpop.permute.xlu1 %654 }
 0xd6f   :  { %v2427_v58 = vmul.f32 %v2222_v49, %v655_v57  ;;  %v1001_v57 = vld [vmem:[#allocation2 + $0x40] sm:$0xff] }
 0xd71   :  { %659 = vrot.lane.b32.xlu0 %v2427_v58, %s2280_s1 }
 0xde3   :  { %v660_v59 = vpop.permute.xlu0 %659 }
 0xde4   :  { %1848 = vmatmul.mubr.msk.f32.vlgmr.msra.gmra.mrb[4].mxu0 %vm131_vm2, %v660_v59  ;;  %v2065_v59 = vpack.c.bf16 %v1001_v57, %v1000_v56  ;;  %v1186_v56 = vld [vmem:[%s2535_s2] sm:$0xff]  ;;  %v1187_v57 = vld [vmem:[%s2535_s2 + $0x8] sm:$0xff] }
 0xde5   :  { %2061 = vmatpush3.bf16.msra.mxu0 %v2330_v8  ;;  %1869 = vmatprep.mubr.msk.f32.mxu0 %vm2277_vm0, %v2278_v1 }
 0xde6   :  { %2062 = vmatprep.subr.bf16.mxu0 %v2276_v0  ;;  %v745_v0 = vrot.slane %v651_v55, 6  ;;  %2066 = vmatprep.subr.bf16.mxu1 %v2065_v59 }
 0xde9   :  { %2064 = vmatpush3.bf16.msra.mxu0 %v2339_v12 }
 0xeb7   :  { %v729_v60 = vpop.f32.mrb[4].mxu0 }
 0xeb8   :  { %v734_v61 = vrot.slane %v729_v60, 6  ;;  %v1849_v62 = vpop.f32.mrb[5].mxu0  ;;  %v1003_v60 = vld [vmem:[#allocation2 + $0x50] sm:$0xff] }
 0xeb9   :  { %v1096_v62 = vld [vmem:[#allocation2 + $0x60] sm:$0xff] }
 0xeba   :  { %v736_v63 = vadd.f32 %v734_v61, %v2359_v16 }
 0xebc   :  { %2225 = vtanh.f32 %v736_v63  ;;  %v1632_v3 = vmul.f32 -1.442695, %v736_v63  ;;  %v1097_v63 = vld [vmem:[#allocation2 + $0x68] sm:$0xff] }
 0xebe   :  { %2227 = vpow2.f32 %v1632_v3 }
 0xec6   :  { %v2226_v2 = vpop.eup %2225 }
 0xec7   :  { %749 = vrot.lane.b32.xlu1 %v2226_v2, %s2279_s11  ;;  %v2073_v2 = vpack.c.bf16 %v1097_v63, %v1096_v62  ;;  %v1487_v63 = vld [vmem:[#allocation2 + $0x180] sm:$0xff] }
 0xec8   :  { %v2228_v4 = vpop.eup %2227 }
 0xec9   :  { %v740_v8 = vadd.f32 1.0, %v2228_v4  ;;  %2074 = vmatprep.subr.bf16.mxu0 %v2073_v2 }
 0xecb   :  { %2229 = vrcp.f32 %v740_v8 }
 0xed5   :  { %v2230_v5 = vpop.eup %2229 }
 0xed6   :  { %v747_v12 = vmul.f32 %v2230_v5, %v745_v0  ;;  %v1098_v0 = vld [vmem:[#allocation2 + $0x70] sm:$0xff] }
 0xf39   :  { %v750_v1 = vpop.permute.xlu1 %749 }
 0xf3a   :  { %v752_v6 = vmul.f32 %v2230_v5, %v750_v1 }
 0xf3c   :  { %754 = vrot.lane.b32.xlu0 %v752_v6, %s2279_s11 }
 0xfae   :  { %v755_v7 = vpop.permute.xlu0 %754 }
 0xfaf   :  { %v757_v9 = vadd.f32 %v755_v7, %v747_v12  ;;  %v1099_v12 = vld [vmem:[#allocation2 + $0x78] sm:$0xff] }
 0xfb0   :  { %v2077_v7 = vpack.c.bf16 %v1099_v12, %v1098_v0  ;;  %v1640_v12 = vld [vmem:[#allocation2 + $0x80] ss:$0 sm:$0xff] }
 0xfb1   :  { %2231 = vtanh.f32 %v757_v9  ;;  %v852_v29 = vrot.slane %v757_v9, 6  ;;  %v1204_v9 = vld [vmem:[#allocation2 + $0x88] sm:$0xff] }
 0xfbb   :  { %v2232_v10 = vpop.eup %2231 }
 0xfbc   :  { %760 = vrot.lane.b32.xlu1 %v2232_v10, %s2279_s11  ;;  %v1205_v10 = vld [vmem:[#allocation2 + $0x90] sm:$0xff] }
0x102e   :  { %v761_v11 = vpop.permute.xlu1 %760 }
0x102f   :  { %v763_v13 = vmul.f32 %v2230_v5, %v761_v11  ;;  %v1190_v11 = vld [vmem:[#allocation2 + $0xf0] sm:$0xff] }
0x1031   :  { %v765_v14 = vrot.slane %v763_v13, 2  ;;  %v997_v36 = vsel %vm991_vm3, %v2427_v58, %v763_v13  ;;  %v1002_v58 = vld [vmem:[#allocation2 + $0x48] sm:$0xff]  ;;  %v2081_v13 = vpack.c.bf16 %v1205_v10, %v1204_v9 }
0x1032   :  { %v2069_v61 = vpack.c.bf16 %v1003_v60, %v1002_v58  ;;  %v1483_v58 = vld [vmem:[#allocation2 + $0x160] sm:$0xff]  ;;  %v1485_v60 = vld [vmem:[#allocation2 + $0x170] sm:$0xff] }
0x1033   :  { %766 = vrot.lane.b32.xlu0 %v765_v14, %s2280_s1  ;;  %v1191_v14 = vld [vmem:[#allocation2 + $0xf8] sm:$0xff] }
0x10a5   :  { %v767_v15 = vpop.permute.xlu0 %766 }
0x10a6   :  { %1859 = vmatmul.mubr.msk.f32.vlgmr.msra.gmra.mrb[8].mxu1 %vm131_vm2, %v767_v15  ;;  %v1206_v15 = vld [vmem:[#allocation2 + $0x98] sm:$0xff] }
0x10a7   :  { %2068 = vmatpush3.bf16.msra.mxu1 %v2065_v59  ;;  %v1484_v59 = vld [vmem:[#allocation2 + $0x168] sm:$0xff] }
0x10a8   :  { %2070 = vmatprep.subr.bf16.mxu1 %v2069_v61 }
0x10ab   :  { %2072 = vmatpush3.bf16.msra.mxu1 %v2069_v61  ;;  %v2153_v61 = vpack.c.bf16 %v1484_v59, %v1483_v58 }
0x10ac   :  { %2082 = vmatprep.subr.bf16.mxu1 %v2081_v13 }
0x1179   :  { %v836_v17 = vpop.f32.mrb[8].mxu1 }
0x117a   :  { %v841_v19 = vrot.slane %v836_v17, 4  ;;  %v1860_v20 = vpop.f32.mrb[9].mxu1  ;;  %v1207_v17 = vld [vmem:[#allocation2 + $0xa0] sm:$0xff] }
0x117b   :  { %v2085_v20 = vpack.c.bf16 %v1207_v17, %v1206_v15  ;;  %v1493_v17 = vld [vmem:[#allocation2 + $0x1b0] sm:$0xff] }
0x117c   :  { %v843_v21 = vadd.f32 %v841_v19, %v2359_v16  ;;  %v2471_v19 = vpack.c.bf16 %v1191_v14, %v1190_v11  ;;  %v1189_v14 = vld [vmem:[%s2535_s2 + $0x18] sm:$0xff] }
0x117e   :  { %2233 = vtanh.f32 %v843_v21  ;;  %v1634_v23 = vmul.f32 -1.442695, %v843_v21  ;;  %v1208_v21 = vld [vmem:[#allocation2 + $0xa8] sm:$0xff] }
0x1180   :  { %2235 = vpow2.f32 %v1634_v23 }
0x1188   :  { %v2234_v22 = vpop.eup %2233 }
0x1189   :  { %856 = vrot.lane.b32.xlu1 %v2234_v22, %s2279_s11  ;;  %v1209_v22 = vld [vmem:[#allocation2 + $0xb0] sm:$0xff] }
0x118a   :  { %v2236_v24 = vpop.eup %2235  ;;  %v2089_v23 = vpack.c.bf16 %v1209_v22, %v1208_v21  ;;  %v1495_v22 = vld [vmem:[#allocation2 + $0x1c0] sm:$0x7f] }
0x118b   :  { %v847_v25 = vadd.f32 1.0, %v2236_v24  ;;  %v1210_v24 = vld [vmem:[#allocation2 + $0xb8] sm:$0xff] }
0x118d   :  { %2237 = vrcp.f32 %v847_v25  ;;  %v1211_v25 = vld [vmem:[#allocation2 + $0xc0] sm:$0xff] }
0x1197   :  { %v2238_v26 = vpop.eup %2237 }
0x1198   :  { %v854_v30 = vmul.f32 %v2238_v26, %v852_v29 }
0x11fb   :  { %v857_v27 = vpop.permute.xlu1 %856 }
0x11fc   :  { %v859_v28 = vmul.f32 %v2238_v26, %v857_v27  ;;  %v1212_v27 = vld [vmem:[#allocation2 + $0xc8] sm:$0xff] }
0x11fe   :  { %861 = vrot.lane.b32.xlu0 %v859_v28, %s2279_s11  ;;  %v1213_v28 = vld [vmem:[#allocation2 + $0xd0] sm:$0xff] }
0x11ff   :  { %v2097_v29 = vpack.c.bf16 %v1213_v28, %v1212_v27 }
0x1270   :  { %v862_v31 = vpop.permute.xlu0 %861 }
0x1271   :  { %v864_v32 = vadd.f32 %v862_v31, %v854_v30  ;;  %v1214_v30 = vld [vmem:[#allocation2 + $0xd8] sm:$0xff]  ;;  %v1215_v31 = vld [vmem:[#allocation2 + $0xe0] sm:$0xff] }
0x1273   :  { %2239 = vtanh.f32 %v864_v32  ;;  %v959_v51 = vrot.slane %v864_v32, 6  ;;  %v2101_v32 = vpack.c.bf16 %v1215_v31, %v1214_v30 }
0x127d   :  { %v2240_v33 = vpop.eup %2239 }
0x127e   :  { %867 = vrot.lane.b32.xlu1 %v2240_v33, %s2279_s11  ;;  %v1637_v33 = vld [vmem:[#allocation2 + $0x58] ss:$0 sm:$0xff] }
0x12f0   :  { %v868_v34 = vpop.permute.xlu1 %867 }
0x12f1   :  { %v870_v35 = vmul.f32 %v2238_v26, %v868_v34  ;;  %v2093_v26 = vpack.c.bf16 %v1211_v25, %v1210_v24  ;;  %v1649_v24 = vld [vmem:[#allocation2 + $0x158] ss:$0 sm:$0xff] }
0x12f3   :  { %v872_v18 = vrot.slane %v870_v35, 4  ;;  %v998_v37 = vsel %vm993_vm4, %v997_v36, %v870_v35 }
0x12f5   :  { %873 = vrot.lane.b32.xlu0 %v872_v18, %s2280_s1 }
0x1367   :  { %v874_v38 = vpop.permute.xlu0 %873 }
0x1368   :  { %1870 = vmatmul.mubr.msk.f32.vlgmr.msra.gmra.mrb[6].mxu0 %vm131_vm2, %v874_v38  ;;  %v1193_v38 = vld [vmem:[#allocation2 + $0x108] sm:$0xff] }
0x1369   :  { %2076 = vmatpush3.bf16.msra.mxu0 %v2073_v2  ;;  %v1488_v2 = vld [vmem:[#allocation2 + $0x188] sm:$0xff] }
0x136a   :  { %2078 = vmatprep.subr.bf16.mxu0 %v2077_v7 }
0x136d   :  { %2080 = vmatpush3.bf16.msra.mxu0 %v2077_v7 }
0x136e   :  { %2106 = vmatprep.subr.bf16.mxu0 %v2471_v19 }
0x143b   :  { %v943_v39 = vpop.f32.mrb[6].mxu0 }
0x143c   :  { %v948_v41 = vrot.slane %v943_v39, 2  ;;  %v1871_v42 = vpop.f32.mrb[7].mxu0 }
0x143e   :  { %v950_v43 = vadd.f32 %v948_v41, %v2359_v16 }
0x1440   :  { %2241 = vtanh.f32 %v950_v43  ;;  %v1636_v45 = vmul.f32 -1.442695, %v950_v43  ;;  %v1194_v43 = vld [vmem:[#allocation2 + $0x110] sm:$0xff] }
0x1442   :  { %2243 = vpow2.f32 %v1636_v45 }
0x144a   :  { %v2242_v44 = vpop.eup %2241 }
0x144b   :  { %963 = vrot.lane.b32.xlu1 %v2242_v44, %s2279_s11  ;;  %v1195_v44 = vld [vmem:[#allocation2 + $0x118] sm:$0xff] }
0x144c   :  { %v2244_v46 = vpop.eup %2243  ;;  %v2480_v45 = vpack.c.bf16 %v1195_v44, %v1194_v43 }
0x144d   :  { %v954_v47 = vadd.f32 1.0, %v2244_v46  ;;  %v1196_v46 = vld [vmem:[#allocation2 + $0x120] sm:$0xff] }
0x144f   :  { %2245 = vrcp.f32 %v954_v47  ;;  %v1197_v47 = vld [vmem:[#allocation2 + $0x128] sm:$0xff] }
0x1459   :  { %v2246_v48 = vpop.eup %2245 }
0x145a   :  { %v961_v52 = vmul.f32 %v2246_v48, %v959_v51 }
0x14bd   :  { %v964_v49 = vpop.permute.xlu1 %963 }
0x14be   :  { %v966_v50 = vmul.f32 %v2246_v48, %v964_v49  ;;  %v1198_v49 = vld [vmem:[#allocation2 + $0x130] sm:$0xff] }
0x14c0   :  { %968 = vrot.lane.b32.xlu0 %v966_v50, %s2279_s11  ;;  %v1199_v50 = vld [vmem:[#allocation2 + $0x138] sm:$0xff] }
0x14c1   :  { %v2121_v51 = vpack.c.bf16 %v1199_v50, %v1198_v49 }
0x14c4   :  { %1011 = vrot.lane.b32.xlu0 %v2414_v40, %s2280_s1 }
0x1532   :  { %v969_v16 = vpop.permute.xlu0 %968 }
0x1533   :  { %v971_v53 = vadd.f32 %v969_v16, %v961_v52  ;;  %v1200_v52 = vld [vmem:[#allocation2 + $0x140] sm:$0xff]  ;;  %v1201_v16 = vld [vmem:[#allocation2 + $0x148] sm:$0xff] }
0x1535   :  { %2247 = vtanh.f32 %v971_v53  ;;  %979 = vrot.lane.b32.xlu0 %v971_v53, %s2279_s11  ;;  %v2125_v53 = vpack.c.bf16 %v1201_v16, %v1200_v52 }
0x1536   :  { %v1012_v54 = vpop.permute.xlu0 %1011 }
0x1537   :  { %1880 = vmatprep.mubr.msk.f32.mxu1 %vm131_vm2, %v1012_v54  ;;  %v1216_v54 = vld [vmem:[#allocation2 + $0xe8] sm:$0x3f] }
0x153f   :  { %v2248_v55 = vpop.eup %2247 }
0x1540   :  { %974 = vrot.lane.b32.xlu1 %v2248_v55, %s2279_s11  ;;  %v1202_v55 = vld [vmem:[#allocation2 + $0x150] sm:$0x3f] }
0x15a7   :  { %v980_v40 = vpop.permute.xlu0 %979 }
0x15a8   :  { %984 = vrot.lane.b32.xlu0 %v980_v40, %s2280_s1  ;;  %v1486_v40 = vld [vmem:[#allocation2 + $0x178] sm:$0xff] }
0x15a9   :  { %v2157_v62 = vpack.c.bf16 %v1486_v40, %v1485_v60 }
0x15b2   :  { %v975_v3 = vpop.permute.xlu1 %974 }
0x15b3   :  { %v977_v4 = vmul.f32 %v2246_v48, %v975_v3  ;;  %v2484_v48 = vpack.c.bf16 %v1197_v47, %v1196_v46  ;;  %v2161_v3 = vpack.c.bf16 %v1488_v2, %v1487_v63 }
0x15b5   :  { %v999_v8 = vsel %vm995_vm5, %v998_v37, %v977_v4  ;;  %v1192_v37 = vld [vmem:[#allocation2 + $0x100] sm:$0xff] }
0x15b6   :  { %1013 = vrot.lane.b32.xlu1 %v999_v8, %s2280_s1  ;;  %v2474_v42 = vpack.c.bf16 %v1193_v38, %v1192_v37  ;;  %v1490_v8 = vld [vmem:[#allocation2 + $0x198] sm:$0xff] }
0x15ba   :  { %982 = vrot.lane.b32.xlu1 %v977_v4, %s2280_s1  ;;  %v1489_v4 = vld [vmem:[#allocation2 + $0x190] sm:$0xff] }
0x161a   :  { %v985_v5 = vpop.permute.xlu0 %984 }
0x161b   :  { %990 = vst.msk [vmem:[%s2538_s5 - $0x4] sm:$0xc0] %vm988_vm6, %v985_v5  ;;  %v2165_v5 = vpack.c.bf16 %v1490_v8, %v1489_v4 }
0x1628   :  { %v1014_v1 = vpop.permute.xlu1 %1013 }
0x1629   :  { %1881 = vmatmul.mubr.msk.f32.vlgmr.msra.gmra.mrb[10].mxu1 %vm131_vm2, %v1014_v1  ;;  %v1491_v1 = vld [vmem:[#allocation2 + $0x1a0] sm:$0xff] }
0x162a   :  { %2084 = vmatpush3.bf16.msra.mxu1 %v2081_v13  ;;  %v1188_v13 = vld [vmem:[%s2535_s2 + $0x10] sm:$0xff] }
0x162b   :  { %2086 = vmatprep.subr.bf16.mxu1 %v2085_v20 }
0x162c   :  { %v983_v6 = vpop.permute.xlu1 %982 }
0x162d   :  { %989 = vst.msk [vmem:[%s2538_s5 - $0x6] sm:$0xc0] %vm988_vm6, %v983_v6  ;;  %v1492_v6 = vld [vmem:[#allocation2 + $0x1a8] sm:$0xff] }
0x162e   :  { %2088 = vmatpush3.bf16.msra.mxu1 %v2085_v20  ;;  %v2169_v0 = vpack.c.bf16 %v1492_v6, %v1491_v1 }
0x162f   :  { %2090 = vmatprep.subr.bf16.mxu1 %v2089_v23 }
0x1632   :  { %2092 = vmatpush3.bf16.msra.mxu1 %v2089_v23 }
0x1633   :  { %2094 = vmatprep.subr.bf16.mxu1 %v2093_v26 }
0x1636   :  { %2096 = vmatpush3.bf16.msra.mxu1 %v2093_v26 }
0x1637   :  { %2098 = vmatprep.subr.bf16.mxu1 %v2097_v29 }
0x163a   :  { %2100 = vmatpush3.bf16.msra.mxu1 %v2097_v29 }
0x163b   :  { %2102 = vmatprep.subr.bf16.mxu1 %v2101_v32 }
0x163e   :  { %2104 = vmatpush3.bf16.msra.mxu1 %v2101_v32 }
0x163f   :  { %1918 = vmatprep.subr.msk.mxu1 %vm995_vm5, %v1216_v54 }
0x1642   :  { %1919 = vmatpush3.msk.msra.mxu1 %vm995_vm5, %v1216_v54 }
0x1643   :  { %2130 = vmatprep.subr.bf16.mxu1 %v2471_v19 }
0x16fc   :  { %v1882_v34 = vpop.f32.mrb[10].mxu1 }
0x16fd   :  { %v1091_v35 = vadd.f32 %v1882_v34, %v1637_v33  ;;  %v1085_v36 = vpop.f32.mrb[11].mxu1 }
0x16fe   :  { %v1086_v18 = vadd.f32 %v1637_v33, %v1085_v36 }
0x16ff   :  { %v1095_v41 = vmax.f32 %v1091_v35, 0.0 }
0x1700   :  { %v1094_v39 = vmax.f32 %v1086_v18, 0.0 }
0x1702   :  { %1891 = vmatprep.mubr.msk.f32.mxu0 %vm131_vm2, %v1094_v39  ;;  %v1653_v39 = vld [vmem:[#allocation2 + $0x1c8] ss:$0 sm:$0xff] }
0x1703   :  { %1892 = vmatmul.mubr.msk.f32.vlgmr.msra.gmra.mrb[8].mxu0 %vm131_vm2, %v1095_v41 }
0x1704   :  { %2108 = vmatpush3.bf16.msra.mxu0 %v2471_v19  ;;  %1949 = vmatprep.mubr.msk.f32.mxu0 %vm1217_vm7, %v1186_v56 }
0x1705   :  { %2110 = vmatprep.subr.bf16.mxu0 %v2474_v42 }
0x1708   :  { %2112 = vmatpush3.bf16.msra.mxu0 %v2474_v42 }
0x1709   :  { %2114 = vmatprep.subr.bf16.mxu0 %v2480_v45 }
0x170c   :  { %2116 = vmatpush3.bf16.msra.mxu0 %v2480_v45 }
0x170d   :  { %2118 = vmatprep.subr.bf16.mxu0 %v2484_v48 }
0x1710   :  { %2120 = vmatpush3.bf16.msra.mxu0 %v2484_v48 }
0x1711   :  { %2122 = vmatprep.subr.bf16.mxu0 %v2121_v51 }
0x1714   :  { %2124 = vmatpush3.bf16.msra.mxu0 %v2121_v51 }
0x1715   :  { %2126 = vmatprep.subr.bf16.mxu0 %v2125_v53 }
0x1718   :  { %2128 = vmatpush3.bf16.msra.mxu0 %v2125_v53 }
0x1719   :  { %1947 = vmatprep.subr.msk.mxu0 %vm995_vm5, %v1202_v55 }
0x171c   :  { %1948 = vmatpush3.msk.msra.mxu0 %vm995_vm5, %v1202_v55 }
0x171d   :  { %1950 = vmatmul.mubr.msk.f32.vlgmr.msra.gmra.mrb[10].mxu0 %vm1217_vm7, %v1187_v57  ;;  %2154 = vmatprep.subr.bf16.mxu0 %v2153_v61 }
0x171e   :  { %2156 = vmatpush3.bf16.msra.mxu0 %v2153_v61 }
0x171f   :  { %2158 = vmatprep.subr.bf16.mxu0 %v2157_v62 }
0x1722   :  { %2160 = vmatpush3.bf16.msra.mxu0 %v2157_v62 }
0x1723   :  { %2162 = vmatprep.subr.bf16.mxu0 %v2161_v3 }
0x1726   :  { %2164 = vmatpush3.bf16.msra.mxu0 %v2161_v3 }
0x1727   :  { %2166 = vmatprep.subr.bf16.mxu0 %v2165_v5 }
0x172a   :  { %2168 = vmatpush3.bf16.msra.mxu0 %v2165_v5 }
0x172b   :  { %2170 = vmatprep.subr.bf16.mxu0 %v2169_v0 }
0x172e   :  { %2172 = vmatpush3.bf16.msra.mxu0 %v2169_v0 }
0x17d6   :  { %v1893_v7 = vpop.f32.mrb[8].mxu0 }
0x17d7   :  { %v1177_v9 = vpop.f32.mrb[9].mxu0  ;;  %v1183_v11 = vadd.f32 %v1893_v7, %v1640_v12 }
0x17d8   :  { %v1178_v10 = vadd.f32 %v1640_v12, %v1177_v9 }
0x17da   :  { %1920 = vmatprep.mubr.msk.f32.mxu1 %vm1217_vm7, %v1178_v10 }
0x17db   :  { %1921 = vmatmul.mubr.msk.f32.vlgmr.msra.gmra.mrb[12].mxu1 %vm1217_vm7, %v1183_v11 }
0x17dc   :  { %2132 = vmatpush3.bf16.msra.mxu1 %v2471_v19  ;;  %1978 = vmatprep.mubr.msk.f32.mxu1 %vm1217_vm7, %v1188_v13  ;;  %v1494_v19 = vld [vmem:[#allocation2 + $0x1b8] sm:$0xff] }
0x17dd   :  { %2134 = vmatprep.subr.bf16.mxu1 %v2474_v42  ;;  %v2173_v21 = vpack.c.bf16 %v1494_v19, %v1493_v17 }
0x17df   :  { %2174 = vmatprep.subr.bf16.mxu0 %v2173_v21 }
0x17e0   :  { %2136 = vmatpush3.bf16.msra.mxu1 %v2474_v42  ;;  %2176 = vmatpush3.bf16.msra.mxu0 %v2173_v21 }
0x17e1   :  { %2138 = vmatprep.subr.bf16.mxu1 %v2480_v45  ;;  %2005 = vmatprep.subr.msk.mxu0 %vm1514_vm8, %v1495_v22 }
0x17e4   :  { %2140 = vmatpush3.bf16.msra.mxu1 %v2480_v45  ;;  %2006 = vmatpush3.msk.msra.mxu0 %vm1514_vm8, %v1495_v22 }
0x17e5   :  { %2142 = vmatprep.subr.bf16.mxu1 %v2484_v48 }
0x17e8   :  { %2144 = vmatpush3.bf16.msra.mxu1 %v2484_v48 }
0x17e9   :  { %2146 = vmatprep.subr.bf16.mxu1 %v2121_v51 }
0x17ec   :  { %2148 = vmatpush3.bf16.msra.mxu1 %v2121_v51 }
0x17ed   :  { %2150 = vmatprep.subr.bf16.mxu1 %v2125_v53 }
0x17f0   :  { %2152 = vmatpush3.bf16.msra.mxu1 %v2125_v53  ;;  %v1951_v15 = vpop.f32.mrb[10].mxu0 }
0x17f1   :  { %1976 = vmatprep.subr.msk.mxu1 %vm995_vm5, %v1202_v55  ;;  %v1377_v20 = vpop.f32.mrb[11].mxu0 }
0x17f4   :  { %1977 = vmatpush3.msk.msra.mxu1 %vm995_vm5, %v1202_v55 }
0x17f5   :  { %1979 = vmatmul.mubr.msk.f32.vlgmr.msra.gmra.mrb[14].mxu1 %vm1217_vm7, %v1189_v14 }
0x18ae   :  { %v1922_v23 = vpop.f32.mrb[12].mxu1 }
0x18af   :  { %v1387_v25 = vadd.f32 %v1951_v15, %v1922_v23  ;;  %v1293_v26 = vpop.f32.mrb[13].mxu1 }
0x18b0   :  { %v1386_v27 = vadd.f32 %v1377_v20, %v1293_v26 }
0x18b1   :  { %v1393_v28 = vadd.f32 %v1649_v24, %v1387_v25 }
0x18b2   :  { %v1392_v29 = vadd.f32 %v1649_v24, %v1386_v27 }
0x18b3   :  { %v1480_v31 = vmax.f32 %v1393_v28, 0.0 }
0x18b4   :  { %v1479_v30 = vmax.f32 %v1392_v29, 0.0 }
0x18b6   :  { %2007 = vmatprep.mubr.msk.f32.mxu0 %vm1501_vm9, %v1479_v30 }
0x18b7   :  { %2008 = vmatmul.mubr.msk.f32.vlgmr.msra.gmra.mrb[12].mxu0 %vm1501_vm9, %v1480_v31 }
0x18c8   :  { %v1980_v32 = vpop.f32.mrb[14].mxu1 }
0x18c9   :  { %v1476_v33 = vadd.f32 %v1980_v32, %v1922_v23  ;;  %v1466_v34 = vpop.f32.mrb[15].mxu1 }
0x18ca   :  { %v1475_v35 = vadd.f32 %v1466_v34, %v1293_v26 }
0x18cb   :  { %v1478_v36 = vadd.f32 %v1649_v24, %v1476_v33 }
0x18cc   :  { %v1477_v18 = vadd.f32 %v1649_v24, %v1475_v35 }
0x18cd   :  { %v1482_v38 = vmax.f32 %v1478_v36, 0.0 }
0x18ce   :  { %v1481_v37 = vmax.f32 %v1477_v18, 0.0 }
0x18d0   :  { %2010 = vmatprep.mubr.msk.f32.mxu0 %vm1501_vm9, %v1481_v37 }
0x18d1   :  { %2011 = vmatmul.mubr.msk.f32.gmra.mrb[14].mxu0 %vm1501_vm9, %v1482_v38 }
0x198a   :  { %v2009_v41 = vpop.f32.mrb[12].mxu0 }
0x198b   :  { %v1590_v42 = vadd.f32 %v2009_v41, %v1653_v39  ;;  %v1584_v43 = vpop.f32.mrb[13].mxu0 }
0x198c   :  { %v1585_v44 = vadd.f32 %v1653_v39, %v1584_v43 }
0x198d   :  { %1605 = vst.msk [vmem:[%s2537_s4 + $0x8] sm:$0xff] %vm1603_vm10, %v1590_v42 }
0x198e   :  { %1604 = vst.msk [vmem:[%s2537_s4] sm:$0xff] %vm1603_vm10, %v1585_v44 }
0x19a4   :  { %v2012_v45 = vpop.f32.mrb[14].mxu0 }
0x19a5   :  { %v1600_v46 = vadd.f32 %v2012_v45, %v1653_v39  ;;  %v1594_v47 = vpop.f32.mrb[15].mxu0 }
0x19a6   :  { %v1595_v48 = vadd.f32 %v1653_v39, %v1594_v47 }
0x19a7   :  { %1607 = vst.msk [vmem:[%s2537_s4 + $0x18] sm:$0xff] %vm1603_vm10, %v1600_v46 }
0x19a8   :  { %1606 = vst.msk [vmem:[%s2537_s4 + $0x10] sm:$0xff] %vm1603_vm10, %v1595_v48 }
0x19a9   :  { %1616 = vsyncpa [#allocation3], 1 }

</bundles_post_ra>
